<compile_context>
chip_gen: v7x
topology: tpu7x:2x2x1
jax: 0.10.0
libtpu: 0.0.40
codegen_flags: <defaults>
</compile_context>

<pallas_src>
import functools

import jax
import jax.numpy as jnp
from jax.experimental import pallas as pl
from jax.experimental.pallas import tpu as pltpu


# --------------------------- VMEM budgeting ----------------------------------
def _vmem_budget_bytes():
    """~Half of physical VMEM: 64 MiB on v5e/v6e (128 MiB), 32 MiB on v7x (64 MiB).
    Falls back to a conservative 32 MiB if the hardware query is unavailable."""
    default = 32 * 1024 * 1024
    try:
        cap = int(pltpu.get_tpu_info().vmem_capacity_bytes)
        return max(default, cap // 2)
    except Exception:
        return default


_VMEM_FILL_FRACTION = 0.7       # keep headroom for compiler scratch / spills
_TARGET_BLOCK_BYTES = 4 * 1024 * 1024


# --------------------------- shared excitation MLP ---------------------------
def _excite(mean_bc, w1, b1, w2, b2):
    """Tiny SE MLP on VPU/XLU (lane reductions only, no MXU).

    mean_bc: (Bb, C) f32 per-channel means
    w1: (hidden, C), b1: (1, hidden), w2: (C, hidden), b2: (1, C)  -- all f32
    returns sigmoid gate (Bb, C) f32
    """
    # fc1: y1[b, h] = sum_c mean[b, c] * w1[h, c]      (lane reduce over C)
    y1 = jnp.sum(mean_bc[:, None, :] * w1[None, :, :], axis=-1) + b1     # (Bb, hidden)
    y1 = jnp.maximum(y1, 0.0)
    # fc2: y2[b, c] = sum_h y1[b, h] * w2[c, h]        (lane reduce over hidden)
    y2 = jnp.sum(y1[:, None, :] * w2[None, :, :], axis=-1) + b2          # (Bb, C)
    return jax.nn.sigmoid(y2)


# --------------------------- fused single-pass kernel ------------------------
def _se_fused_kernel(x_ref, w1_ref, b1_ref, w2_ref, b2_ref, o_ref, *, inv_hw):
    """x_ref/o_ref: (Bb, C, HW). Squeeze + excite + scale in one pass (x read once)."""
    x = x_ref[...]                                                        # native dtype
    # Squeeze: f32 accumulation without materializing an f32 copy of x.
    mean = jnp.sum(x, axis=-1, dtype=jnp.float32) * inv_hw                # (Bb, C)
    gate = _excite(mean, w1_ref[...], b1_ref[...], w2_ref[...], b2_ref[...])  # (Bb, C)
    # Scale in x's dtype (cast the tiny gate, not the big tile).
    o_ref[...] = (x * gate[:, :, None].astype(x.dtype)).astype(o_ref.dtype)


# --------------------------- streamed fallback kernels -----------------------
def _se_squeeze_kernel(x_ref, mean_ref, *, inv_hw):
    """x_ref: (Rb, HW) rows of x viewed as (B*C, HW); mean_ref: (Rb, 1) f32."""
    mean_ref[...] = jnp.sum(x_ref[...], axis=-1, keepdims=True,
                            dtype=jnp.float32) * inv_hw


def _se_excite_kernel(mean_ref, w1_ref, b1_ref, w2_ref, b2_ref, gate_ref):
    """mean_ref/gate_ref: (B, C) f32."""
    gate_ref[...] = _excite(mean_ref[...], w1_ref[...], b1_ref[...],
                            w2_ref[...], b2_ref[...])


def _se_scale_kernel(x_ref, gate_ref, o_ref):
    """x_ref/o_ref: (Rb, HW); gate_ref: (Rb, 1) f32. out = x * gate."""
    x = x_ref[...]
    o_ref[...] = (x * gate_ref[...].astype(x.dtype)).astype(o_ref.dtype)


# --------------------------- block-size pickers -------------------------------
def _pick_batch_block(B, C, HW, hidden, itemsize, fill_budget):
    """How many batches per fused block: divides B, in+out double-buffered fits
    the budget, MLP intermediates stay small, block targets ~4 MiB."""
    slab = C * HW * itemsize
    bb = 1
    for cand in range(2, B + 1):
        if B % cand:
            continue
        if 4 * cand * slab > fill_budget:            # 2 bufs each for in + out
            break
        if cand * C * max(hidden, 1) * 4 > (2 << 20):  # cap MLP intermediate size
            break
        bb = cand
        if cand * slab >= _TARGET_BLOCK_BYTES:
            break
    return bb


def _pick_row_block(n_rows, row_bytes, fill_budget):
    """Row block for the streamed path: divides n_rows, multiple of 8 sublanes
    (or full), in+out double-buffered within budget, targeting ~4 MiB blocks."""
    max_rows = max(1, fill_budget // (4 * row_bytes))
    target_rows = max(1, _TARGET_BLOCK_BYTES // row_bytes)
    cands = [d for d in range(1, n_rows + 1)
             if n_rows % d == 0 and (d % 8 == 0 or d == n_rows)]
    if not cands:
        return n_rows
    fitting = [d for d in cands if d <= max_rows]
    if not fitting:
        return min(cands)                 # smallest legal block; vmem limit has headroom
    under = [d for d in fitting if d <= target_rows]
    return max(under) if under else min(fitting)


# --------------------------- wrapper ------------------------------------------
def se_module_forward(x, w1, b1, w2, b2, *, force_streamed=False):
    """x: (B, C, H, W) NCHW. w1: (hidden, C), b1: (hidden,), w2: (C, hidden), b2: (C,)."""
    B, C, H, W = x.shape
    hidden = w1.shape[0]
    HW = H * W
    inv_hw = 1.0 / HW
    itemsize = jnp.dtype(x.dtype).itemsize

    budget = _vmem_budget_bytes()
    fill = int(_VMEM_FILL_FRACTION * budget)

    # Tiny parameter reshapes (glue, done once in XLA). Kept in their natural
    # layouts so the in-kernel MLP uses lane (minor-dim) reductions only.
    w1f = w1.astype(jnp.float32)                    # (hidden, C)
    b1r = b1.reshape(1, hidden).astype(jnp.float32)
    w2f = w2.astype(jnp.float32)                    # (C, hidden)
    b2r = b2.reshape(1, C).astype(jnp.float32)

    x_flat = x.reshape(B, C, HW)
    slab = C * HW * itemsize
    param_bytes = 4 * 2 * (2 * C * hidden + hidden + C)   # f32, double-buffered

    # ---------------- fused single-pass path (read x once, write once) --------
    if (not force_streamed) and (4 * slab + param_bytes <= fill):
        Bb = _pick_batch_block(B, C, HW, hidden, itemsize, fill - param_bytes)
        out_flat = pl.pallas_call(
            functools.partial(_se_fused_kernel, inv_hw=inv_hw),
            out_shape=jax.ShapeDtypeStruct((B, C, HW), x.dtype),
            grid_spec=pltpu.PrefetchScalarGridSpec(
                num_scalar_prefetch=0,
                grid=(B // Bb,),
                in_specs=[
                    pl.BlockSpec((Bb, C, HW), lambda i: (i, 0, 0)),
                    pl.BlockSpec((hidden, C), lambda i: (0, 0)),
                    pl.BlockSpec((1, hidden), lambda i: (0, 0)),
                    pl.BlockSpec((C, hidden), lambda i: (0, 0)),
                    pl.BlockSpec((1, C), lambda i: (0, 0)),
                ],
                out_specs=pl.BlockSpec((Bb, C, HW), lambda i: (i, 0, 0)),
            ),
            compiler_params=pltpu.CompilerParams(
                dimension_semantics=("parallel",),
                vmem_limit_bytes=budget),
        )(x_flat, w1f, b1r, w2f, b2r)
        return out_flat.reshape(B, C, H, W)

    # ---------------- streamed 3-stage fallback (slab too big for VMEM) -------
    n_rows = B * C
    x2d = x_flat.reshape(n_rows, HW)
    row_bytes = HW * itemsize
    Rb = _pick_row_block(n_rows, row_bytes, fill)
    nR = n_rows // Rb

    # 1) squeeze: per-(b, c) means, lane-dense full-HW blocks, row-tiled.
    means = pl.pallas_call(
        functools.partial(_se_squeeze_kernel, inv_hw=inv_hw),
        out_shape=jax.ShapeDtypeStruct((n_rows, 1), jnp.float32),
        grid_spec=pltpu.PrefetchScalarGridSpec(
            num_scalar_prefetch=0,
            grid=(nR,),
            in_specs=[pl.BlockSpec((Rb, HW), lambda i: (i, 0))],
            out_specs=pl.BlockSpec((Rb, 1), lambda i: (i, 0)),
        ),
        compiler_params=pltpu.CompilerParams(
            dimension_semantics=("parallel",),
            vmem_limit_bytes=budget),
    )(x2d)

    # 2) excitation: tiny per-batch MLP + sigmoid on the (B, C) means.
    gate = pl.pallas_call(
        _se_excite_kernel,
        out_shape=jax.ShapeDtypeStruct((B, C), jnp.float32),
        grid_spec=pltpu.PrefetchScalarGridSpec(
            num_scalar_prefetch=0,
            grid=(1,),
            in_specs=[
                pl.BlockSpec((B, C), lambda i: (0, 0)),
                pl.BlockSpec((hidden, C), lambda i: (0, 0)),
                pl.BlockSpec((1, hidden), lambda i: (0, 0)),
                pl.BlockSpec((C, hidden), lambda i: (0, 0)),
                pl.BlockSpec((1, C), lambda i: (0, 0)),
            ],
            out_specs=pl.BlockSpec((B, C), lambda i: (0, 0)),
        ),
        compiler_params=pltpu.CompilerParams(
            dimension_semantics=("arbitrary",),
            vmem_limit_bytes=budget),
    )(means.reshape(B, C), w1f, b1r, w2f, b2r)

    # 3) scale: broadcast multiply, same row tiling as the squeeze.
    out2d = pl.pallas_call(
        _se_scale_kernel,
        out_shape=jax.ShapeDtypeStruct((n_rows, HW), x.dtype),
        grid_spec=pltpu.PrefetchScalarGridSpec(
            num_scalar_prefetch=0,
            grid=(nR,),
            in_specs=[
                pl.BlockSpec((Rb, HW), lambda i: (i, 0)),
                pl.BlockSpec((Rb, 1), lambda i: (i, 0)),
            ],
            out_specs=pl.BlockSpec((Rb, HW), lambda i: (i, 0)),
        ),
        compiler_params=pltpu.CompilerParams(
            dimension_semantics=("parallel",),
            vmem_limit_bytes=budget),
    )(x2d, gate.reshape(n_rows, 1))

    return out2d.reshape(B, C, H, W)


# ------------------------- pure-JAX reference --------------------------------
def reference_forward(x, w1, b1, w2, b2):
    y = jnp.mean(x, axis=(2, 3))                              # (B, C)
    y = jnp.maximum(y @ w1.T + b1, 0.0)                       # (B, hidden)
    y = jax.nn.sigmoid(y @ w2.T + b2)                         # (B, C)
    return x * y[:, :, None, None]


if __name__ == "__main__":
    # in_channels must be >= reduction for the PyTorch module to be valid.
    B, C, H, W, reduction = 2, 32, 16, 16, 16
    hidden = C // reduction

    key = jax.random.PRNGKey(0)
    k1, k2, k3, k4, k5 = jax.random.split(key, 5)

    x = jax.random.normal(k1, (B, C, H, W), jnp.float32)
    w1 = 0.3 * jax.random.normal(k2, (hidden, C), jnp.float32)   # fc1.weight
    b1 = 0.1 * jax.random.normal(k3, (hidden,), jnp.float32)     # fc1.bias
    w2 = 0.3 * jax.random.normal(k4, (C, hidden), jnp.float32)   # fc2.weight
    b2 = 0.1 * jax.random.normal(k5, (C,), jnp.float32)          # fc2.bias

    ref = reference_forward(x, w1, b1, w2, b2)

    # Fused single-pass path (auto-selected for shapes that fit VMEM).
    out = jax.block_until_ready(se_module_forward(x, w1, b1, w2, b2))
    assert out.shape == (B, C, H, W)
    assert jnp.allclose(out, ref, atol=1e-4, rtol=1e-4), (
        float(jnp.max(jnp.abs(out - ref))))

    # Streamed 3-stage fallback path (used for slabs too big for VMEM).
    out_s = jax.block_until_ready(
        se_module_forward(x, w1, b1, w2, b2, force_streamed=True))
    assert jnp.allclose(out_s, ref, atol=1e-4, rtol=1e-4), (
        float(jnp.max(jnp.abs(out_s - ref))))

    print("KERNEL_OK")
</pallas_src>

<mosaic_0001>
module attributes {stable_mosaic.version = 11 : i64} {
  func.func @_se_fused_kernel(%arg0: i32, %arg1: memref<2x32x256xf32, #tpu.memory_space<vmem>>, %arg2: memref<2x32xf32, #tpu.memory_space<vmem>>, %arg3: memref<1x2xf32, #tpu.memory_space<vmem>>, %arg4: memref<32x2xf32, #tpu.memory_space<vmem>>, %arg5: memref<1x32xf32, #tpu.memory_space<vmem>>, %arg6: memref<2x32x256xf32, #tpu.memory_space<vmem>>) attributes {dimension_semantics = [#tpu.dimension_semantics<parallel>], iteration_bounds = array<i64: 1>, scalar_prefetch = 0 : i64, scratch_operands = 0 : i64, tpu.core_type = #tpu.core_type<tc>, window_params = [{transform_indices = @transform_0, window_bounds = array<i64: 2, 32, 256>}, {pipeline_mode = #tpu.pipeline_mode<synchronous>, transform_indices = @transform_1, window_bounds = array<i64: 2, 32>}, {pipeline_mode = #tpu.pipeline_mode<synchronous>, transform_indices = @transform_2, window_bounds = array<i64: 1, 2>}, {pipeline_mode = #tpu.pipeline_mode<synchronous>, transform_indices = @transform_3, window_bounds = array<i64: 32, 2>}, {pipeline_mode = #tpu.pipeline_mode<synchronous>, transform_indices = @transform_4, window_bounds = array<i64: 1, 32>}, {transform_indices = @transform_5, window_bounds = array<i64: 2, 32, 256>}]} {
    %c0 = arith.constant 0 : index
    %c0_0 = arith.constant 0 : index
    %c0_1 = arith.constant 0 : index
    %0 = vector.load %arg1[%c0, %c0_0, %c0_1] : memref<2x32x256xf32, #tpu.memory_space<vmem>>, vector<2x32x256xf32>
    %cst = arith.constant dense<0.000000e+00> : vector<2x32xf32>
    %1 = vector.multi_reduction <add>, %0, %cst [2] : vector<2x32x256xf32> to vector<2x32xf32>
    %cst_2 = arith.constant 3.906250e-03 : f32
    %2 = vector.broadcast %cst_2 : f32 to vector<2x32xf32>
    %3 = arith.mulf %1, %2 : vector<2x32xf32>
    %c0_3 = arith.constant 0 : index
    %c0_4 = arith.constant 0 : index
    %4 = vector.load %arg2[%c0_3, %c0_4] : memref<2x32xf32, #tpu.memory_space<vmem>>, vector<2x32xf32>
    %c0_5 = arith.constant 0 : index
    %c0_6 = arith.constant 0 : index
    %5 = vector.load %arg3[%c0_5, %c0_6] : memref<1x2xf32, #tpu.memory_space<vmem>>, vector<1x2xf32>
    %c0_7 = arith.constant 0 : index
    %c0_8 = arith.constant 0 : index
    %6 = vector.load %arg4[%c0_7, %c0_8] : memref<32x2xf32, #tpu.memory_space<vmem>>, vector<32x2xf32>
    %c0_9 = arith.constant 0 : index
    %c0_10 = arith.constant 0 : index
    %7 = vector.load %arg5[%c0_9, %c0_10] : memref<1x32xf32, #tpu.memory_space<vmem>>, vector<1x32xf32>
    %8 = vector.shape_cast %3 : vector<2x32xf32> to vector<2x1x32xf32>
    %9 = vector.shape_cast %4 : vector<2x32xf32> to vector<1x2x32xf32>
    %10 = vector.broadcast %8 : vector<2x1x32xf32> to vector<2x2x32xf32>
    %11 = vector.broadcast %9 : vector<1x2x32xf32> to vector<2x2x32xf32>
    %12 = arith.mulf %10, %11 : vector<2x2x32xf32>
    %cst_11 = arith.constant dense<0.000000e+00> : vector<2x2xf32>
    %13 = vector.multi_reduction <add>, %12, %cst_11 [2] : vector<2x2x32xf32> to vector<2x2xf32>
    %14 = vector.broadcast %5 : vector<1x2xf32> to vector<2x2xf32>
    %15 = arith.addf %13, %14 : vector<2x2xf32>
    %cst_12 = arith.constant 0.000000e+00 : f32
    %16 = vector.broadcast %cst_12 : f32 to vector<2x2xf32>
    %17 = arith.maximumf %15, %16 : vector<2x2xf32>
    %18 = vector.shape_cast %17 : vector<2x2xf32> to vector<2x1x2xf32>
    %19 = vector.shape_cast %6 : vector<32x2xf32> to vector<1x32x2xf32>
    %20 = vector.broadcast %18 : vector<2x1x2xf32> to vector<2x32x2xf32>
    %21 = vector.broadcast %19 : vector<1x32x2xf32> to vector<2x32x2xf32>
    %22 = arith.mulf %20, %21 : vector<2x32x2xf32>
    %cst_13 = arith.constant dense<0.000000e+00> : vector<2x32xf32>
    %23 = vector.multi_reduction <add>, %22, %cst_13 [2] : vector<2x32x2xf32> to vector<2x32xf32>
    %24 = vector.broadcast %7 : vector<1x32xf32> to vector<2x32xf32>
    %25 = arith.addf %23, %24 : vector<2x32xf32>
    %26 = arith.negf %25 : vector<2x32xf32>
    %27 = math.exp %26 : vector<2x32xf32>
    %cst_14 = arith.constant 1.000000e+00 : f32
    %28 = vector.broadcast %cst_14 : f32 to vector<2x32xf32>
    %29 = arith.addf %28, %27 : vector<2x32xf32>
    %30 = arith.divf %28, %29 : vector<2x32xf32>
    %31 = vector.shape_cast %30 : vector<2x32xf32> to vector<2x32x1xf32>
    %32 = vector.broadcast %31 : vector<2x32x1xf32> to vector<2x32x256xf32>
    %33 = arith.mulf %0, %32 : vector<2x32x256xf32>
    %c0_15 = arith.constant 0 : index
    %c0_16 = arith.constant 0 : index
    %c0_17 = arith.constant 0 : index
    %34 = vector.load %arg6[%c0_15, %c0_16, %c0_17] : memref<2x32x256xf32, #tpu.memory_space<vmem>>, vector<2x32x256xf32>
    tpu.vector_store %arg6[%c0_15, %c0_16, %c0_17], %33 {strides = array<i32>} : memref<2x32x256xf32, #tpu.memory_space<vmem>>, vector<2x32x256xf32>,
    return
  }
  func.func @transform_0(%arg0: i32) -> (i32, i32, i32) {
    %c0_i32 = arith.constant 0 : i32
    %c0_i32_0 = arith.constant 0 : i32
    %c0_i32_1 = arith.constant 0 : i32
    return %arg0, %c0_i32, %c0_i32_0 : i32, i32, i32
  }
  func.func @transform_1(%arg0: i32) -> (i32, i32) {
    %c0_i32 = arith.constant 0 : i32
    %c0_i32_0 = arith.constant 0 : i32
    %c0_i32_1 = arith.constant 0 : i32
    return %c0_i32, %c0_i32_0 : i32, i32
  }
  func.func @transform_2(%arg0: i32) -> (i32, i32) {
    %c0_i32 = arith.constant 0 : i32
    %c0_i32_0 = arith.constant 0 : i32
    %c0_i32_1 = arith.constant 0 : i32
    return %c0_i32, %c0_i32_0 : i32, i32
  }
  func.func @transform_3(%arg0: i32) -> (i32, i32) {
    %c0_i32 = arith.constant 0 : i32
    %c0_i32_0 = arith.constant 0 : i32
    %c0_i32_1 = arith.constant 0 : i32
    return %c0_i32, %c0_i32_0 : i32, i32
  }
  func.func @transform_4(%arg0: i32) -> (i32, i32) {
    %c0_i32 = arith.constant 0 : i32
    %c0_i32_0 = arith.constant 0 : i32
    %c0_i32_1 = arith.constant 0 : i32
    return %c0_i32, %c0_i32_0 : i32, i32
  }
  func.func @transform_5(%arg0: i32) -> (i32, i32, i32) {
    %c0_i32 = arith.constant 0 : i32
    %c0_i32_0 = arith.constant 0 : i32
    %c0_i32_1 = arith.constant 0 : i32
    return %arg0, %c0_i32, %c0_i32_0 : i32, i32, i32
  }
}

</mosaic_0001>

<bundles_post_ra>
// kernel: tpu_custom_call.1
= control target key start
LH: loop header
LB: loop body
LE: loop exit
PB: predicated region body
PF: predicated region fallthrough
CT: control target
= control target key end

     0   :  { %10 = vsyncpa [#allocation3], 0  ;;  %s2079_s0 = inlined_call_operand.hbm [shape: f32[2,32,256], index: 0, kind: input, shape index: {}]   ;;  %s2080_s1 = inlined_call_operand.vmem [shape: f32[2,32], index: 1, kind: input, shape index: {}]   ;;  %s2081_s2 = inlined_call_operand.vmem [shape: f32[1,2], index: 2, kind: input, shape index: {}]   ;;  %s2082_s3 = inlined_call_operand.vmem [shape: f32[32,2], index: 3, kind: input, shape index: {}]   ;;  %s2083_s4 = inlined_call_operand.vmem [shape: f32[1,32], index: 4, kind: input, shape index: {}]   ;;  %s2084_s5 = inlined_call_operand.hbm [shape: f32[2,32,256], index: 5, kind: output, shape index: {}]  }
   0x1   :  { %11 = vsyncpa [#allocation4], 0  ;;  %s1539_s18 = smov [#allocation2]   ;;  %s1491_s22 = scalar_lea.hbm %s2079_s0, 2048 }
   0x2   :  { %s17_s19 = sshll.u32 %s1539_s18, 4  ;;  %p1492_p0 = scmp.ne.s32.totalorder %s2079_s0, %s1491_s22  ;;  %s18_s19 = int_to_ptr.vmem [resolvable:$true] %s17_s19 }
   0x3   :  { %p1495_p1 = scmp.lt.u32.totalorder %s1491_s22, %s2079_s0 }
   0x5   :  { %p1497_p2 = pnand %p1495_p1, %p1492_p0 }
   0x7   :  { %1500 = shalt.err (!%p1497_p2)
}
   0x8   :  { %s1501_s27 = scalar_lea.vmem %s18_s19, 2048  ;;  %p1506_p4 = scmp.lt.s32.totalorder %s18_s19, %s18_s19 }
   0x9   :  { %p1502_p3 = scmp.ne.s32.totalorder %s18_s19, %s1501_s27  ;;  %p1507_p5 = scmp.lt.s32.totalorder %s1501_s27, %s1501_s27 }
   0xb   :  { %p1508_p6 = por %p1507_p5, %p1506_p4 }
   0xd   :  { %p1509_p7 = pnand %p1508_p6, %p1502_p3 }
   0xf   :  { %1512 = shalt.err (!%p1509_p7)
}
  0x10   :  { %s1540_s28 = smov 256   ;;  %s1541_s29 = smov 16  }
  0x11   :  { %23 = dma.hbm_to_vmem [thread:$0]  %s2079_s0, 2048, %s18_s19, [#allocation3], %s1540_s28, %s1540_s28, %s1541_s29  }
  0x12   :  { %1535 = dma.done.wait [#allocation3], 2048  }
  0x13   :  { %1536 = vsyncadd [#allocation3], 4294965248  ;;  %v39_v0 = vld [vmem:[#allocation2 + $0x20] sm:$0xff]  ;;  %v40_v1 = vld [vmem:[#allocation2 + $0x28] sm:$0xff]  ;;  %v91_v24 = vlaneseq  ;;  %v1542_v30 = vmov 0   ;;  %vm228_vm0 = vcmask 130112  }
  0x14   :  { %v35_v2 = vld [vmem:[#allocation2] sm:$0xff]  ;;  %v57_v3 = vadd.f32 %v40_v1, %v39_v0  ;;  %v36_v4 = vld [vmem:[#allocation2 + $0x8] sm:$0xff]  ;;  %v41_v5 = vld [vmem:[#allocation2 + $0x30] sm:$0xff]  ;;  %1442 = vset.pattern.permute.xlu1 %v1542_v30  ;;  %1441 = vset.pattern.permute.xlu0 %v1542_v30  ;;  %vm235_vm1 = vcmask 195712   ;;  %vm242_vm2 = vcmask 261312   ;;  %vm301_vm3 = vcmask 1041409  }
  0x15   :  { %v42_v6 = vld [vmem:[#allocation2 + $0x38] sm:$0xff]  ;;  %v51_v7 = vadd.f32 %v36_v4, %v35_v2  ;;  %v37_v8 = vld [vmem:[#allocation2 + $0x10] sm:$0xff]  ;;  %v43_v14 = vld [vmem:[#allocation2 + $0x40] sm:$0xff]  ;;  %v1590_v25 = vshrl.u32 %v91_v24, 7  ;;  %vm306_vm4 = vcmask 254976   ;;  %vm1163_vm5 = vcmask 1042434  }
  0x16   :  { %v38_v9 = vld [vmem:[#allocation2 + $0x18] sm:$0xff]  ;;  %58 = vadd.xlane.f32.xlu1 %v57_v3  ;;  %v60_v10 = vadd.f32 %v42_v6, %v41_v5  ;;  %v45_v12 = vld [vmem:[#allocation2 + $0x50] sm:$0xff]  ;;  %v44_v15 = vld [vmem:[#allocation2 + $0x48] sm:$0xff]  ;;  %vm1165_vm6 = vcmask 1043459   ;;  %vm1167_vm7 = vcmask 1044484   ;;  %vm1169_vm8 = vcmask 1045509  }
  0x17   :  { %52 = vadd.xlane.f32.xlu0 %v51_v7  ;;  %v54_v11 = vadd.f32 %v38_v9, %v37_v8  ;;  %v46_v13 = vld [vmem:[#allocation2 + $0x58] sm:$0xff]  ;;  %v63_v17 = vadd.f32 %v44_v15, %v43_v14  ;;  %v49_v18 = vld [vmem:[#allocation2 + $0x70] sm:$0xff]  ;;  %v47_v20 = vld [vmem:[#allocation2 + $0x60] sm:$0xff]  ;;  %v1593_v26 = vsub.s32 0, %v1590_v25  ;;  %v1600_v29 = vsub.s32 1, %v1590_v25 }
  0x18   :  { %v66_v16 = vadd.f32 %v46_v13, %v45_v12  ;;  %v50_v19 = vld [vmem:[#allocation2 + $0x78] sm:$0xff]  ;;  %v48_v21 = vld [vmem:[#allocation2 + $0x68] sm:$0xff]  ;;  %v83_v27 = vld [vmem:[%s2080_s1] sm:$0x3]  ;;  %v1607_v33 = vsub.s32 2, %v1590_v25  ;;  %v360_v37 = vsub.s32 4, %v1590_v25 }
  0x19   :  { %v72_v22 = vadd.f32 %v50_v19, %v49_v18  ;;  %v69_v23 = vadd.f32 %v48_v21, %v47_v20  ;;  %v94_v28 = vrot.slane %v83_v27, %v1593_v26  ;;  %v113_v31 = vrot.slane %v83_v27, %v1600_v29  ;;  %v85_v32 = vld [vmem:[%s2082_s3] sm:$0xff]  ;;  %v86_v45 = vld [vmem:[%s2082_s3 + $0x8] sm:$0xff]  ;;  %v87_v55 = vld [vmem:[%s2082_s3 + $0x10] sm:$0xff] }
  0x1a   :  { %61 = vadd.xlane.f32.xlu1 %v60_v10  ;;  %v1426_v34 = vld [vmem:[%s2081_s2] ss:$0 sm:$0xff]  ;;  %v333_v35 = vrot.slane %v85_v32, %v1593_v26  ;;  %v347_v36 = vrot.slane %v85_v32, %v1607_v33  ;;  %v340_v38 = vrot.slane %v85_v32, %v1600_v29  ;;  %v353_v39 = vsub.s32 3, %v1590_v25  ;;  %v1644_v0 = vld [vmem:[%s2082_s3 + $0x18] sm:$0xff] }
  0x1b   :  { %55 = vadd.xlane.f32.xlu0 %v54_v11  ;;  %v361_v40 = vrot.slane %v85_v32, %v360_v37  ;;  %v1618_v41 = vsub.s32 6, %v1590_v25  ;;  %v367_v43 = vsub.s32 5, %v1590_v25  ;;  %v1626_v47 = vsub.s32 7, %v1590_v25 }
  0x1c   :  { %v354_v42 = vrot.slane %v85_v32, %v353_v39  ;;  %v389_v48 = vrot.slane %v86_v45, %v1593_v26  ;;  %v403_v50 = vrot.slane %v86_v45, %v1607_v33  ;;  %v396_v51 = vrot.slane %v86_v45, %v1600_v29 }
  0x1d   :  { %v375_v44 = vrot.slane %v85_v32, %v1618_v41  ;;  %v368_v46 = vrot.slane %v85_v32, %v367_v43  ;;  %v382_v49 = vrot.slane %v85_v32, %v1626_v47  ;;  %v417_v52 = vrot.slane %v86_v45, %v360_v37 }
  0x1e   :  { %67 = vadd.xlane.f32.xlu1 %v66_v16  ;;  %v410_v53 = vrot.slane %v86_v45, %v353_v39  ;;  %v431_v54 = vrot.slane %v86_v45, %v1618_v41  ;;  %v424_v56 = vrot.slane %v86_v45, %v367_v43  ;;  %v445_v57 = vrot.slane %v87_v55, %v1593_v26 }
  0x1f   :  { %64 = vadd.xlane.f32.xlu0 %v63_v17  ;;  %v438_v58 = vrot.slane %v86_v45, %v1626_v47  ;;  %v459_v59 = vrot.slane %v87_v55, %v1607_v33  ;;  %v452_v60 = vrot.slane %v87_v55, %v1600_v29  ;;  %v473_v61 = vrot.slane %v87_v55, %v360_v37 }
  0x20   :  { %v466_v62 = vrot.slane %v87_v55, %v353_v39  ;;  %v487_v63 = vrot.slane %v87_v55, %v1618_v41  ;;  %v480_v1 = vrot.slane %v87_v55, %v367_v43  ;;  %v501_v2 = vrot.slane %v1644_v0, %v1593_v26 }
  0x21   :  { %v494_v3 = vrot.slane %v87_v55, %v1626_v47  ;;  %v515_v4 = vrot.slane %v1644_v0, %v1607_v33  ;;  %v508_v5 = vrot.slane %v1644_v0, %v1600_v29  ;;  %v529_v6 = vrot.slane %v1644_v0, %v360_v37 }
  0x22   :  { %73 = vadd.xlane.f32.xlu1 %v72_v22  ;;  %v522_v7 = vrot.slane %v1644_v0, %v353_v39  ;;  %v536_v8 = vrot.slane %v1644_v0, %v367_v43  ;;  %vm1171_vm9 = vcmask 1046534   ;;  %vm1173_vm10 = vcmask 1047559  }
  0x23   :  { %70 = vadd.xlane.f32.xlu0 %v69_v23  ;;  %vm1232_vm11 = vcmask 15360  }
  0x33   :  { %100 = vbcast.lane.b32.xlu1 %v94_v28, 264 }
  0x37   :  { %104 = vbcast.lane.b32.xlu1 %v94_v28, 272 }
  0x39   :  { %96 = vbcast.lane.b32.xlu0 %v94_v28, 256 }
  0x3b   :  { %108 = vbcast.lane.b32.xlu1 %v94_v28, 280 }
  0x3d   :  { %115 = vbcast.lane.b32.xlu0 %v113_v31, 256 }
  0x3f   :  { %119 = vbcast.lane.b32.xlu1 %v113_v31, 264 }
  0x41   :  { %123 = vbcast.lane.b32.xlu0 %v113_v31, 272 }
  0x43   :  { %127 = vbcast.lane.b32.xlu1 %v113_v31, 280 }
  0x45   :  { %319 = vbcast.lane.b32.xlu0 %v1426_v34, 256 }
  0x47   :  { %335 = vbcast.lane.b32.xlu1 %v333_v35, 256 }
  0x49   :  { %349 = vbcast.lane.b32.xlu0 %v347_v36, 256 }
  0x4b   :  { %342 = vbcast.lane.b32.xlu1 %v340_v38, 256 }
  0x4d   :  { %363 = vbcast.lane.b32.xlu0 %v361_v40, 256 }
  0x4f   :  { %356 = vbcast.lane.b32.xlu1 %v354_v42, 256 }
  0x51   :  { %377 = vbcast.lane.b32.xlu0 %v375_v44, 256 }
  0x53   :  { %370 = vbcast.lane.b32.xlu1 %v368_v46, 256 }
  0x55   :  { %391 = vbcast.lane.b32.xlu0 %v389_v48, 256 }
  0x57   :  { %384 = vbcast.lane.b32.xlu1 %v382_v49, 256 }
  0x59   :  { %405 = vbcast.lane.b32.xlu0 %v403_v50, 256 }
  0x5b   :  { %398 = vbcast.lane.b32.xlu1 %v396_v51, 256 }
  0x5d   :  { %419 = vbcast.lane.b32.xlu0 %v417_v52, 256  ;;  %v550_v52 = vrot.slane %v1644_v0, %v1626_v47 }
  0x5f   :  { %412 = vbcast.lane.b32.xlu1 %v410_v53, 256 }
  0x61   :  { %433 = vbcast.lane.b32.xlu0 %v431_v54, 256  ;;  %v543_v54 = vrot.slane %v1644_v0, %v1618_v41 }
  0x63   :  { %426 = vbcast.lane.b32.xlu1 %v424_v56, 256 }
  0x65   :  { %447 = vbcast.lane.b32.xlu0 %v445_v57, 256 }
  0x67   :  { %440 = vbcast.lane.b32.xlu1 %v438_v58, 256 }
  0x69   :  { %461 = vbcast.lane.b32.xlu0 %v459_v59, 256 }
  0x6b   :  { %454 = vbcast.lane.b32.xlu1 %v452_v60, 256 }
  0x6d   :  { %475 = vbcast.lane.b32.xlu0 %v473_v61, 256 }
  0x6f   :  { %468 = vbcast.lane.b32.xlu1 %v466_v62, 256 }
  0x71   :  { %489 = vbcast.lane.b32.xlu0 %v487_v63, 256 }
  0x73   :  { %482 = vbcast.lane.b32.xlu1 %v480_v1, 256 }
  0x75   :  { %503 = vbcast.lane.b32.xlu0 %v501_v2, 256 }
  0x77   :  { %496 = vbcast.lane.b32.xlu1 %v494_v3, 256 }
  0x79   :  { %517 = vbcast.lane.b32.xlu0 %v515_v4, 256 }
  0x7b   :  { %510 = vbcast.lane.b32.xlu1 %v508_v5, 256 }
  0x7d   :  { %531 = vbcast.lane.b32.xlu0 %v529_v6, 256 }
  0x7f   :  { %524 = vbcast.lane.b32.xlu1 %v522_v7, 256 }
  0x83   :  { %538 = vbcast.lane.b32.xlu1 %v536_v8, 256 }
  0xa3   :  { %v59_v9 = vpop.xlane.xlu1 %58 }
  0xa4   :  { %v53_v10 = vpop.xlane.xlu0 %52  ;;  %v77_v23 = vmul.f32 0.00390625, %v59_v9 }
  0xa5   :  { %v75_v18 = vmul.f32 0.00390625, %v53_v10 }
  0xa7   :  { %v62_v11 = vpop.xlane.xlu1 %61 }
  0xa8   :  { %v56_v12 = vpop.xlane.xlu0 %55  ;;  %v78_v29 = vmul.f32 0.00390625, %v62_v11 }
  0xa9   :  { %v76_v17 = vmul.f32 0.00390625, %v56_v12 }
  0xab   :  { %v68_v13 = vpop.xlane.xlu1 %67 }
  0xac   :  { %v65_v14 = vpop.xlane.xlu0 %64  ;;  %v80_v42 = vmul.f32 0.00390625, %v68_v13 }
  0xad   :  { %v79_v37 = vmul.f32 0.00390625, %v65_v14 }
  0xaf   :  { %v74_v15 = vpop.xlane.xlu1 %73 }
  0xb0   :  { %v71_v16 = vpop.xlane.xlu0 %70  ;;  %v82_v46 = vmul.f32 0.00390625, %v74_v15 }
  0xb1   :  { %v81_v43 = vmul.f32 0.00390625, %v71_v16 }
  0xb3   :  { %v101_v19 = vpop.permute.xlu1 %100 }
  0xb4   :  { %v138_v20 = vmul.f32 %v101_v19, %v76_v17  ;;  %v97_v21 = vpop.permute.xlu0 %96  ;;  %v146_v44 = vmul.f32 %v101_v19, %v80_v42 }
  0xb5   :  { %v137_v22 = vmul.f32 %v97_v21, %v75_v18  ;;  %v145_v39 = vmul.f32 %v97_v21, %v79_v37  ;;  %v218_v21 = vand.u32 127, %v91_v24 }
  0xb6   :  { %173 = vperm.xlu1 %1442, %v138_v20  }
  0xb7   :  { %170 = vperm.xlu0 %1441, %v137_v22   ;;  %v105_v26 = vpop.permute.xlu1 %104 }
  0xb8   :  { %v139_v27 = vmul.f32 %v105_v26, %v77_v23  ;;  %v116_v28 = vpop.permute.xlu0 %115  ;;  %v147_v45 = vmul.f32 %v105_v26, %v81_v43  ;;  %v223_v26 = vadd.s32 4294967288, %v218_v21 }
  0xb9   :  { %v141_v31 = vmul.f32 %v116_v28, %v75_v18  ;;  %v149_v48 = vmul.f32 %v116_v28, %v79_v37  ;;  %v237_v28 = vadd.s32 4294967272, %v218_v21 }
  0xba   :  { %176 = vperm.xlu1 %1442, %v139_v27   ;;  %v230_v27 = vadd.s32 4294967280, %v218_v21 }
  0xbb   :  { %v109_v30 = vpop.permute.xlu1 %108 }
  0xbc   :  { %v140_v32 = vmul.f32 %v109_v30, %v78_v29  ;;  %v124_v33 = vpop.permute.xlu0 %123  ;;  %v148_v49 = vmul.f32 %v109_v30, %v82_v46 }
  0xbd   :  { %v143_v35 = vmul.f32 %v124_v33, %v77_v23  ;;  %v151_v50 = vmul.f32 %v124_v33, %v81_v43  ;;  %v233_v33 = vsub.s32 %v230_v27, %v1590_v25 }
  0xbe   :  { %179 = vperm.xlu0 %1441, %v140_v32   ;;  %182 = vperm.xlu1 %1442, %v141_v31   ;;  %v1724_v31 = vsub.s32 %v218_v21, %v1590_v25  ;;  %v226_v32 = vsub.s32 %v223_v26, %v1590_v25 }
  0xbf   :  { %v120_v34 = vpop.permute.xlu1 %119 }
  0xc0   :  { %v142_v36 = vmul.f32 %v120_v34, %v76_v17  ;;  %v150_v51 = vmul.f32 %v120_v34, %v80_v42  ;;  %v1664_v57 = vpop.permute.xlu0 %319  ;;  %v240_v34 = vsub.s32 %v237_v28, %v1590_v25 }
  0xc2   :  { %185 = vperm.xlu0 %1441, %v142_v36   ;;  %188 = vperm.xlu1 %1442, %v143_v35  }
  0xc3   :  { %v128_v38 = vpop.permute.xlu1 %127 }
  0xc4   :  { %v144_v40 = vmul.f32 %v128_v38, %v78_v29  ;;  %v152_v53 = vmul.f32 %v128_v38, %v82_v46  ;;  %v1668_v59 = vpop.permute.xlu0 %349 }
  0xc6   :  { %191 = vperm.xlu0 %1441, %v144_v40   ;;  %194 = vperm.xlu1 %1442, %v145_v39  }
  0xc7   :  { %v1660_v55 = vpop.permute.xlu1 %335 }
  0xc8   :  { %v1672_v47 = vpop.permute.xlu0 %363 }
  0xca   :  { %197 = vperm.xlu0 %1441, %v146_v44   ;;  %200 = vperm.xlu1 %1442, %v147_v45  }
  0xcb   :  { %v1662_v56 = vpop.permute.xlu1 %342 }
  0xcc   :  { %v1676_v62 = vpop.permute.xlu0 %377 }
  0xce   :  { %203 = vperm.xlu0 %1441, %v148_v49   ;;  %206 = vperm.xlu1 %1442, %v149_v48  }
  0xcf   :  { %v1666_v58 = vpop.permute.xlu1 %356 }
  0xd0   :  { %v1680_v63 = vpop.permute.xlu0 %391 }
  0xd2   :  { %209 = vperm.xlu0 %1441, %v150_v51   ;;  %212 = vperm.xlu1 %1442, %v151_v50  }
  0xd3   :  { %v1670_v60 = vpop.permute.xlu1 %370 }
  0xd4   :  { %v1684_v1 = vpop.permute.xlu0 %405 }
  0xd6   :  { %215 = vperm.xlu0 %1441, %v152_v53   ;;  %552 = vbcast.lane.b32.xlu1 %v550_v52, 256 }
  0xd7   :  { %v1674_v61 = vpop.permute.xlu1 %384 }
  0xd8   :  { %v1688_v3 = vpop.permute.xlu0 %419 }
  0xda   :  { %545 = vbcast.lane.b32.xlu0 %v543_v54, 256 }
  0xdb   :  { %v1678_v41 = vpop.permute.xlu1 %398 }
  0xdc   :  { %v1692_v5 = vpop.permute.xlu0 %433 }
  0xdf   :  { %v1682_v0 = vpop.permute.xlu1 %412 }
  0xe0   :  { %v1696_v7 = vpop.permute.xlu0 %447 }
  0xe3   :  { %v1686_v2 = vpop.permute.xlu1 %426 }
  0xe4   :  { %v1700_v9 = vpop.permute.xlu0 %461 }
  0xe7   :  { %v1690_v4 = vpop.permute.xlu1 %440 }
  0xe8   :  { %v1704_v11 = vpop.permute.xlu0 %475 }
  0xeb   :  { %v1694_v6 = vpop.permute.xlu1 %454 }
  0xec   :  { %v1708_v13 = vpop.permute.xlu0 %489 }
  0xef   :  { %v1698_v8 = vpop.permute.xlu1 %468 }
  0xf0   :  { %v1712_v15 = vpop.permute.xlu0 %503 }
  0xf3   :  { %v1702_v10 = vpop.permute.xlu1 %482 }
  0xf4   :  { %v1716_v17 = vpop.permute.xlu0 %517 }
  0xf7   :  { %v1706_v12 = vpop.permute.xlu1 %496 }
  0xf8   :  { %v1720_v19 = vpop.permute.xlu0 %531 }
  0xfb   :  { %v1710_v14 = vpop.permute.xlu1 %510 }
  0xff   :  { %v1714_v16 = vpop.permute.xlu1 %524 }
 0x103   :  { %v1718_v18 = vpop.permute.xlu1 %538 }
 0x135   :  { %v174_v20 = vpop.permute.xlu1 %173 }
 0x136   :  { %v171_v22 = vpop.permute.xlu0 %170  ;;  %v227_v37 = vrot.slane %v174_v20, %v226_v32 }
 0x137   :  { %v222_v24 = vrot.slane %v171_v22, %v1724_v31 }
 0x139   :  { %v177_v23 = vpop.permute.xlu1 %176  ;;  %v229_v25 = vsel %vm228_vm0, %v227_v37, %v222_v24 }
 0x13a   :  { %v234_v40 = vrot.slane %v177_v23, %v233_v33 }
 0x13c   :  { %v236_v49 = vsel %vm235_vm1, %v234_v40, %v229_v25 }
 0x13d   :  { %v183_v29 = vpop.permute.xlu1 %182  ;;  %v180_v30 = vpop.permute.xlu0 %179 }
 0x13e   :  { %v247_v38 = vrot.slane %v183_v29, %v1724_v31  ;;  %v241_v43 = vrot.slane %v180_v30, %v240_v34 }
 0x140   :  { %v243_v51 = vsel %vm242_vm2, %v241_v43, %v236_v49 }
 0x141   :  { %v189_v35 = vpop.permute.xlu1 %188  ;;  %v186_v36 = vpop.permute.xlu0 %185 }
 0x142   :  { %v251_v39 = vrot.slane %v186_v36, %v226_v32  ;;  %v256_v42 = vrot.slane %v189_v35, %v233_v33 }
 0x144   :  { %v252_v44 = vsel %vm228_vm0, %v251_v39, %v247_v38 }
 0x145   :  { %v195_v45 = vpop.permute.xlu1 %194  ;;  %v192_v46 = vpop.permute.xlu0 %191  ;;  %v257_v50 = vsel %vm235_vm1, %v256_v42, %v252_v44 }
 0x146   :  { %v261_v48 = vrot.slane %v192_v46, %v240_v34  ;;  %v266_v29 = vrot.slane %v195_v45, %v1724_v31 }
 0x148   :  { %v262_v52 = vsel %vm242_vm2, %v261_v48, %v257_v50 }
 0x149   :  { %v201_v53 = vpop.permute.xlu1 %200  ;;  %v198_v54 = vpop.permute.xlu0 %197  ;;  %v302_v20 = vsel %vm301_vm3, %v262_v52, %v243_v51 }
 0x14a   :  { %v307_v21 = vsel %vm306_vm4, %v302_v20, 0.0  ;;  %v270_v26 = vrot.slane %v198_v54, %v226_v32  ;;  %v275_v36 = vrot.slane %v201_v53, %v233_v33 }
 0x14b   :  { %308 = vadd.xlane.f32.xlu1 %v307_v21 }
 0x14c   :  { %v271_v24 = vsel %vm228_vm0, %v270_v26, %v266_v29 }
 0x14d   :  { %v207_v22 = vpop.permute.xlu1 %206  ;;  %v204_v23 = vpop.permute.xlu0 %203  ;;  %v276_v43 = vsel %vm235_vm1, %v275_v36, %v271_v24 }
 0x14e   :  { %v285_v30 = vrot.slane %v207_v22, %v1724_v31  ;;  %v280_v38 = vrot.slane %v204_v23, %v240_v34 }
 0x150   :  { %v281_v46 = vsel %vm242_vm2, %v280_v38, %v276_v43 }
 0x151   :  { %v213_v27 = vpop.permute.xlu1 %212  ;;  %v210_v28 = vpop.permute.xlu0 %209 }
 0x152   :  { %v289_v35 = vrot.slane %v210_v28, %v226_v32  ;;  %v294_v37 = vrot.slane %v213_v27, %v233_v33 }
 0x154   :  { %v290_v39 = vsel %vm228_vm0, %v289_v35, %v285_v30 }
 0x155   :  { %v216_v40 = vpop.permute.xlu0 %215  ;;  %v295_v44 = vsel %vm235_vm1, %v294_v37, %v290_v39  ;;  %v553_v33 = vpop.permute.xlu1 %552 }
 0x156   :  { %v299_v42 = vrot.slane %v216_v40, %v240_v34 }
 0x158   :  { %v300_v45 = vsel %vm242_vm2, %v299_v42, %v295_v44 }
 0x159   :  { %v303_v25 = vsel %vm301_vm3, %v300_v45, %v281_v46  ;;  %v546_v54 = vpop.permute.xlu0 %545 }
 0x15a   :  { %v310_v32 = vsel %vm306_vm4, %v303_v25, 0.0 }
 0x15b   :  { %311 = vadd.xlane.f32.xlu0 %v310_v32 }
 0x1d8   :  { %v309_v48 = vpop.xlane.xlu1 %308 }
 0x1d9   :  { %v322_v49 = vadd.f32 %v1664_v57, %v309_v48 }
 0x1db   :  { %v1750_v50 = vmax.f32 %v322_v49, 0.0 }
 0x1dd   :  { %v586_v34 = vmul.f32 %v1660_v55, %v1750_v50  ;;  %v587_v51 = vmul.f32 %v1662_v56, %v1750_v50  ;;  %v589_v52 = vmul.f32 %v1666_v58, %v1750_v50  ;;  %v588_v53 = vmul.f32 %v1668_v59, %v1750_v50 }
 0x1de   :  { %v1761_v20 = vmul.f32 %v546_v54, %v1750_v50  ;;  %v1764_v21 = vmul.f32 %v553_v33, %v1750_v50  ;;  %v591_v22 = vmul.f32 %v1670_v60, %v1750_v50  ;;  %v590_v23 = vmul.f32 %v1672_v47, %v1750_v50 }
 0x1df   :  { %718 = vperm.xlu1 %1442, %v587_v51   ;;  %715 = vperm.xlu0 %1441, %v586_v34   ;;  %v593_v26 = vmul.f32 %v1674_v61, %v1750_v50  ;;  %v592_v28 = vmul.f32 %v1676_v62, %v1750_v50  ;;  %v595_v30 = vmul.f32 %v1678_v41, %v1750_v50 }
 0x1e0   :  { %v594_v35 = vmul.f32 %v1680_v63, %v1750_v50  ;;  %v597_v37 = vmul.f32 %v1682_v0, %v1750_v50  ;;  %v596_v24 = vmul.f32 %v1684_v1, %v1750_v50  ;;  %v599_v39 = vmul.f32 %v1686_v2, %v1750_v50 }
 0x1e1   :  { %v598_v40 = vmul.f32 %v1688_v3, %v1750_v50  ;;  %v601_v42 = vmul.f32 %v1690_v4, %v1750_v50  ;;  %v600_v43 = vmul.f32 %v1692_v5, %v1750_v50  ;;  %v603_v44 = vmul.f32 %v1694_v6, %v1750_v50 }
 0x1e2   :  { %v602_v46 = vmul.f32 %v1696_v7, %v1750_v50  ;;  %v605_v45 = vmul.f32 %v1698_v8, %v1750_v50  ;;  %v604_v25 = vmul.f32 %v1700_v9, %v1750_v50  ;;  %v607_v32 = vmul.f32 %v1702_v10, %v1750_v50 }
 0x1e3   :  { %724 = vperm.xlu1 %1442, %v589_v52   ;;  %721 = vperm.xlu0 %1441, %v588_v53   ;;  %v610_v48 = vmul.f32 %v1712_v15, %v1750_v50  ;;  %v608_v49 = vmul.f32 %v1708_v13, %v1750_v50  ;;  %v611_v51 = vmul.f32 %v1710_v14, %v1750_v50 }
 0x1e7   :  { %730 = vperm.xlu1 %1442, %v591_v22   ;;  %727 = vperm.xlu0 %1441, %v590_v23  }
 0x1e8   :  { %v312_v27 = vpop.xlane.xlu0 %311 }
 0x1e9   :  { %v323_v29 = vadd.f32 %v1664_v57, %v312_v27 }
 0x1eb   :  { %736 = vperm.xlu1 %1442, %v593_v26   ;;  %733 = vperm.xlu0 %1441, %v592_v28   ;;  %v1779_v36 = vmax.f32 %v323_v29, 0.0  ;;  %v613_v26 = vmul.f32 %v1714_v16, %v1750_v50  ;;  %v615_v28 = vmul.f32 %v1718_v18, %v1750_v50 }
 0x1ed   :  { %v1786_v57 = vmul.f32 %v546_v54, %v1779_v36  ;;  %v1789_v38 = vmul.f32 %v553_v33, %v1779_v36  ;;  %v606_v33 = vmul.f32 %v1704_v11, %v1750_v50  ;;  %v618_v34 = vmul.f32 %v1660_v55, %v1779_v36 }
 0x1ee   :  { %v626_v52 = vmul.f32 %v1680_v63, %v1779_v36  ;;  %v619_v53 = vmul.f32 %v1662_v56, %v1779_v36  ;;  %v634_v54 = vmul.f32 %v1696_v7, %v1779_v36  ;;  %v627_v22 = vmul.f32 %v1678_v41, %v1779_v36 }
 0x1ef   :  { %742 = vperm.xlu1 %1442, %v595_v30   ;;  %739 = vperm.xlu0 %1441, %v594_v35   ;;  %v642_v55 = vmul.f32 %v1712_v15, %v1779_v36  ;;  %v635_v23 = vmul.f32 %v1694_v6, %v1779_v36  ;;  %v612_v56 = vmul.f32 %v1716_v17, %v1750_v50 }
 0x1f0   :  { %v643_v63 = vmul.f32 %v1710_v14, %v1779_v36  ;;  %v628_v41 = vmul.f32 %v1684_v1, %v1779_v36  ;;  %v620_v7 = vmul.f32 %v1668_v59, %v1779_v36  ;;  %v644_v6 = vmul.f32 %v1716_v17, %v1779_v36 }
 0x1f1   :  { %v636_v15 = vmul.f32 %v1700_v9, %v1779_v36  ;;  %v621_v14 = vmul.f32 %v1666_v58, %v1779_v36  ;;  %v637_v59 = vmul.f32 %v1698_v8, %v1779_v36  ;;  %v629_v1 = vmul.f32 %v1682_v0, %v1779_v36 }
 0x1f2   :  { %v614_v9 = vmul.f32 %v1720_v19, %v1750_v50  ;;  %v645_v17 = vmul.f32 %v1714_v16, %v1779_v36  ;;  %v630_v58 = vmul.f32 %v1688_v3, %v1779_v36  ;;  %v622_v27 = vmul.f32 %v1672_v47, %v1779_v36 }
 0x1f3   :  { %748 = vperm.xlu1 %1442, %v597_v37   ;;  %745 = vperm.xlu0 %1441, %v596_v24   ;;  %v646_v0 = vmul.f32 %v1720_v19, %v1779_v36  ;;  %v638_v8 = vmul.f32 %v1704_v11, %v1779_v36  ;;  %v623_v16 = vmul.f32 %v1670_v60, %v1779_v36 }
 0x1f4   :  { %v639_v47 = vmul.f32 %v1702_v10, %v1779_v36  ;;  %v631_v3 = vmul.f32 %v1686_v2, %v1779_v36  ;;  %v647_v11 = vmul.f32 %v1718_v18, %v1779_v36  ;;  %v632_v60 = vmul.f32 %v1692_v5, %v1779_v36 }
 0x1f5   :  { %v624_v19 = vmul.f32 %v1676_v62, %v1779_v36  ;;  %v640_v10 = vmul.f32 %v1708_v13, %v1779_v36  ;;  %v609_v2 = vmul.f32 %v1706_v12, %v1750_v50  ;;  %v633_v5 = vmul.f32 %v1690_v4, %v1779_v36 }
 0x1f6   :  { %v625_v62 = vmul.f32 %v1674_v61, %v1779_v36  ;;  %v641_v13 = vmul.f32 %v1706_v12, %v1779_v36 }
 0x1f7   :  { %754 = vperm.xlu1 %1442, %v599_v39   ;;  %751 = vperm.xlu0 %1441, %v598_v40  }
 0x1fb   :  { %760 = vperm.xlu1 %1442, %v601_v42   ;;  %757 = vperm.xlu0 %1441, %v600_v43  }
 0x1ff   :  { %766 = vperm.xlu1 %1442, %v603_v44   ;;  %763 = vperm.xlu0 %1441, %v602_v46  }
 0x203   :  { %772 = vperm.xlu1 %1442, %v605_v45   ;;  %769 = vperm.xlu0 %1441, %v604_v25  }
 0x207   :  { %778 = vperm.xlu1 %1442, %v607_v32   ;;  %775 = vperm.xlu0 %1441, %v606_v33  }
 0x20b   :  { %787 = vperm.xlu1 %1442, %v610_v48   ;;  %781 = vperm.xlu0 %1441, %v608_v49  }
 0x20f   :  { %811 = vperm.xlu1 %1442, %v618_v34   ;;  %790 = vperm.xlu0 %1441, %v611_v51  }
 0x213   :  { %835 = vperm.xlu1 %1442, %v626_v52   ;;  %814 = vperm.xlu0 %1441, %v619_v53  }
 0x217   :  { %859 = vperm.xlu1 %1442, %v634_v54   ;;  %838 = vperm.xlu0 %1441, %v627_v22  }
 0x21b   :  { %883 = vperm.xlu1 %1442, %v642_v55   ;;  %862 = vperm.xlu0 %1441, %v635_v23  }
 0x21f   :  { %793 = vperm.xlu1 %1442, %v612_v56   ;;  %886 = vperm.xlu0 %1441, %v643_v63  }
 0x223   :  { %841 = vperm.xlu1 %1442, %v628_v41   ;;  %817 = vperm.xlu0 %1441, %v620_v7  }
 0x227   :  { %889 = vperm.xlu1 %1442, %v644_v6   ;;  %865 = vperm.xlu0 %1441, %v636_v15  }
 0x22b   :  { %820 = vperm.xlu1 %1442, %v621_v14   ;;  %796 = vperm.xlu0 %1441, %v613_v26  }
 0x22f   :  { %868 = vperm.xlu1 %1442, %v637_v59   ;;  %844 = vperm.xlu0 %1441, %v629_v1  }
 0x233   :  { %799 = vperm.xlu1 %1442, %v614_v9   ;;  %892 = vperm.xlu0 %1441, %v645_v17  }
 0x237   :  { %847 = vperm.xlu1 %1442, %v630_v58   ;;  %823 = vperm.xlu0 %1441, %v622_v27  }
 0x23b   :  { %895 = vperm.xlu1 %1442, %v646_v0   ;;  %871 = vperm.xlu0 %1441, %v638_v8  }
 0x23f   :  { %826 = vperm.xlu1 %1442, %v623_v16   ;;  %802 = vperm.xlu0 %1441, %v615_v28  }
 0x243   :  { %874 = vperm.xlu1 %1442, %v639_v47   ;;  %850 = vperm.xlu0 %1441, %v631_v3  }
 0x247   :  { %805 = vperm.xlu1 %1442, %v1761_v20   ;;  %898 = vperm.xlu0 %1441, %v647_v11  }
 0x24b   :  { %853 = vperm.xlu1 %1442, %v632_v60   ;;  %829 = vperm.xlu0 %1441, %v624_v19  }
 0x24f   :  { %901 = vperm.xlu1 %1442, %v1786_v57   ;;  %877 = vperm.xlu0 %1441, %v640_v10  }
 0x253   :  { %808 = vperm.xlu1 %1442, %v1764_v21   ;;  %784 = vperm.xlu0 %1441, %v609_v2  }
 0x257   :  { %856 = vperm.xlu1 %1442, %v633_v5   ;;  %832 = vperm.xlu0 %1441, %v625_v62  }
 0x25b   :  { %904 = vperm.xlu1 %1442, %v1789_v38   ;;  %880 = vperm.xlu0 %1441, %v641_v13  }
 0x25e   :  { %v719_v18 = vpop.permute.xlu1 %718  ;;  %v716_v20 = vpop.permute.xlu0 %715 }
 0x25f   :  { %v913_v30 = vrot.slane %v719_v18, %v1724_v31  ;;  %v909_v4 = vrot.slane %v716_v20, %v1724_v31 }
 0x261   :  { %v1162_v24 = vsel %vm301_vm3, %v913_v30, %v909_v4 }
 0x262   :  { %v725_v50 = vpop.permute.xlu1 %724  ;;  %v722_v29 = vpop.permute.xlu0 %721 }
 0x263   :  { %v917_v61 = vrot.slane %v722_v29, %v1724_v31  ;;  %v921_v12 = vrot.slane %v725_v50, %v1724_v31 }
 0x265   :  { %v1164_v57 = vsel %vm1163_vm5, %v917_v61, %v1162_v24 }
 0x266   :  { %v731_v21 = vpop.permute.xlu1 %730  ;;  %v728_v35 = vpop.permute.xlu0 %727  ;;  %v1166_v42 = vsel %vm1165_vm6, %v921_v12, %v1164_v57 }
 0x267   :  { %v925_v38 = vrot.slane %v728_v35, %v1724_v31  ;;  %v929_v40 = vrot.slane %v731_v21, %v1724_v31 }
 0x269   :  { %v1168_v44 = vsel %vm1167_vm7, %v925_v38, %v1166_v42 }
 0x26a   :  { %v737_v37 = vpop.permute.xlu1 %736  ;;  %v734_v36 = vpop.permute.xlu0 %733  ;;  %v1170_v49 = vsel %vm1169_vm8, %v929_v40, %v1168_v44 }
 0x26b   :  { %v933_v46 = vrot.slane %v734_v36, %v1724_v31  ;;  %v937_v33 = vrot.slane %v737_v37, %v1724_v31 }
 0x26d   :  { %v1172_v51 = vsel %vm1171_vm9, %v933_v46, %v1170_v49 }
 0x26e   :  { %v743_v39 = vpop.permute.xlu1 %742  ;;  %v740_v43 = vpop.permute.xlu0 %739  ;;  %v1174_v23 = vsel %vm1173_vm10, %v937_v33, %v1172_v51 }
 0x26f   :  { %v945_v45 = vrot.slane %v743_v39, %v1724_v31  ;;  %v941_v25 = vrot.slane %v740_v43, %v1724_v31  ;;  %v1233_v15 = vsel %vm1232_vm11, %v1174_v23, 0.0 }
 0x271   :  { %v1175_v52 = vsel %vm301_vm3, %v945_v45, %v941_v25 }
 0x272   :  { %v749_v32 = vpop.permute.xlu1 %748  ;;  %v746_v48 = vpop.permute.xlu0 %745 }
 0x273   :  { %v949_v34 = vrot.slane %v746_v48, %v1724_v31  ;;  %v953_v53 = vrot.slane %v749_v32, %v1724_v31 }
 0x275   :  { %v1176_v54 = vsel %vm1163_vm5, %v949_v34, %v1175_v52 }
 0x276   :  { %v755_v22 = vpop.permute.xlu1 %754  ;;  %v752_v55 = vpop.permute.xlu0 %751  ;;  %v1177_v41 = vsel %vm1165_vm6, %v953_v53, %v1176_v54 }
 0x277   :  { %v957_v56 = vrot.slane %v752_v55, %v1724_v31  ;;  %v961_v63 = vrot.slane %v755_v22, %v1724_v31 }
 0x279   :  { %v1178_v7 = vsel %vm1167_vm7, %v957_v56, %v1177_v41 }
 0x27a   :  { %v761_v6 = vpop.permute.xlu1 %760  ;;  %1234 = vadd.xlane.f32.xlu0 %v1233_v15  ;;  %v758_v26 = vpop.permute.xlu0 %757  ;;  %v1179_v1 = vsel %vm1169_vm8, %v961_v63, %v1178_v7 }
 0x27b   :  { %v969_v14 = vrot.slane %v761_v6, %v1724_v31  ;;  %v965_v59 = vrot.slane %v758_v26, %v1724_v31 }
 0x27d   :  { %v1180_v17 = vsel %vm1171_vm9, %v965_v59, %v1179_v1 }
 0x27e   :  { %v767_v9 = vpop.permute.xlu1 %766  ;;  %v764_v27 = vpop.permute.xlu0 %763  ;;  %v1181_v0 = vsel %vm1173_vm10, %v969_v14, %v1180_v17 }
 0x27f   :  { %v977_v58 = vrot.slane %v767_v9, %v1724_v31  ;;  %v973_v8 = vrot.slane %v764_v27, %v1724_v31  ;;  %v1236_v16 = vsel %vm1232_vm11, %v1181_v0, 0.0 }
 0x280   :  { %1237 = vadd.xlane.f32.xlu1 %v1236_v16 }
 0x281   :  { %v1182_v28 = vsel %vm301_vm3, %v977_v58, %v973_v8 }
 0x282   :  { %v773_v47 = vpop.permute.xlu1 %772  ;;  %v770_v11 = vpop.permute.xlu0 %769 }
 0x283   :  { %v985_v3 = vrot.slane %v773_v47, %v1724_v31  ;;  %v981_v60 = vrot.slane %v770_v11, %v1724_v31 }
 0x285   :  { %v1183_v19 = vsel %vm1163_vm5, %v981_v60, %v1182_v28 }
 0x286   :  { %v779_v10 = vpop.permute.xlu1 %778  ;;  %v1184_v5 = vsel %vm1165_vm6, %v985_v3, %v1183_v19  ;;  %v776_v62 = vpop.permute.xlu0 %775 }
 0x287   :  { %v993_v2 = vrot.slane %v779_v10, %v1724_v31  ;;  %v989_v13 = vrot.slane %v776_v62, %v1724_v31 }
 0x289   :  { %v1185_v18 = vsel %vm1167_vm7, %v989_v13, %v1184_v5 }
 0x28a   :  { %v788_v20 = vpop.permute.xlu1 %787  ;;  %v782_v50 = vpop.permute.xlu0 %781  ;;  %v1186_v29 = vsel %vm1169_vm8, %v993_v2, %v1185_v18 }
 0x28b   :  { %v997_v21 = vrot.slane %v782_v50, %v1724_v31  ;;  %v1005_v61 = vrot.slane %v788_v20, %v1724_v31 }
 0x28d   :  { %v1936_v4 = vsel %vm1171_vm9, %v997_v21, %v1186_v29 }
 0x28e   :  { %v812_v30 = vpop.permute.xlu1 %811  ;;  %v791_v35 = vpop.permute.xlu0 %790 }
 0x28f   :  { %v1009_v37 = vrot.slane %v791_v35, %v1724_v31  ;;  %v1037_v57 = vrot.slane %v812_v30, %v1724_v31 }
 0x291   :  { %v1941_v24 = vsel %vm301_vm3, %v1009_v37, %v1005_v61 }
 0x292   :  { %v836_v12 = vpop.permute.xlu1 %835  ;;  %v815_v36 = vpop.permute.xlu0 %814 }
 0x293   :  { %v1041_v38 = vrot.slane %v815_v36, %v1724_v31  ;;  %v1069_v60 = vrot.slane %v836_v12, %v1724_v31 }
 0x295   :  { %v1946_v39 = vsel %vm301_vm3, %v1041_v38, %v1037_v57 }
 0x296   :  { %v1948_v40 = vpop.permute.xlu1 %859  ;;  %v839_v42 = vpop.permute.xlu0 %838 }
 0x297   :  { %v1073_v11 = vrot.slane %v839_v42, %v1724_v31  ;;  %v1101_v20 = vrot.slane %v1948_v40, %v1724_v31 }
 0x299   :  { %v1203_v50 = vsel %vm301_vm3, %v1073_v11, %v1069_v60 }
 0x29a   :  { %v884_v43 = vpop.permute.xlu1 %883  ;;  %v1950_v44 = vpop.permute.xlu0 %862 }
 0x29b   :  { %v1133_v25 = vrot.slane %v884_v43, %v1724_v31  ;;  %v1105_v29 = vrot.slane %v1950_v44, %v1724_v31 }
 0x29e   :  { %v794_v46 = vpop.permute.xlu1 %793  ;;  %v887_v45 = vpop.permute.xlu0 %886 }
 0x29f   :  { %v1137_v32 = vrot.slane %v887_v45, %v1724_v31  ;;  %v1013_v19 = vrot.slane %v794_v46, %v1724_v31 }
 0x2a1   :  { %v1217_v33 = vsel %vm301_vm3, %v1137_v32, %v1133_v25  ;;  %v1190_v12 = vsel %vm1163_vm5, %v1013_v19, %v1941_v24 }
 0x2a2   :  { %v842_v48 = vpop.permute.xlu1 %841  ;;  %v818_v49 = vpop.permute.xlu0 %817 }
 0x2a3   :  { %v1077_v10 = vrot.slane %v842_v48, %v1724_v31  ;;  %v1045_v5 = vrot.slane %v818_v49, %v1724_v31 }
 0x2a5   :  { %v1204_v36 = vsel %vm1163_vm5, %v1077_v10, %v1203_v50  ;;  %v1197_v42 = vsel %vm1163_vm5, %v1045_v5, %v1946_v39 }
 0x2a6   :  { %v890_v34 = vpop.permute.xlu1 %889  ;;  %v1956_v52 = vpop.permute.xlu0 %865 }
 0x2a7   :  { %v1141_v51 = vrot.slane %v890_v34, %v1724_v31  ;;  %v1109_v43 = vrot.slane %v1956_v52, %v1724_v31 }
 0x2a9   :  { %v1218_v53 = vsel %vm1163_vm5, %v1141_v51, %v1217_v33 }
 0x2aa   :  { %v821_v54 = vpop.permute.xlu1 %820  ;;  %v797_v22 = vpop.permute.xlu0 %796 }
 0x2ab   :  { %v1017_v62 = vrot.slane %v797_v22, %v1724_v31  ;;  %v1049_v30 = vrot.slane %v821_v54, %v1724_v31 }
 0x2ad   :  { %v1191_v44 = vsel %vm1165_vm6, %v1017_v62, %v1190_v12  ;;  %v1198_v48 = vsel %vm1165_vm6, %v1049_v30, %v1197_v42 }
 0x2ae   :  { %v1959_v55 = vpop.permute.xlu1 %868  ;;  %v845_v23 = vpop.permute.xlu0 %844 }
 0x2af   :  { %v1081_v21 = vrot.slane %v845_v23, %v1724_v31 }
 0x2b1   :  { %v1205_v24 = vsel %vm1165_vm6, %v1081_v21, %v1204_v36 }
 0x2b2   :  { %v800_v56 = vpop.permute.xlu1 %799  ;;  %v893_v63 = vpop.permute.xlu0 %892 }
 0x2b3   :  { %v1145_v41 = vrot.slane %v893_v63, %v1724_v31  ;;  %v1021_v35 = vrot.slane %v800_v56, %v1724_v31 }
 0x2b5   :  { %v1219_v7 = vsel %vm1165_vm6, %v1145_v41, %v1218_v53  ;;  %v1192_v39 = vsel %vm1167_vm7, %v1021_v35, %v1191_v44 }
 0x2b6   :  { %v848_v6 = vpop.permute.xlu1 %847  ;;  %v1963_v15 = vpop.permute.xlu0 %823 }
 0x2b7   :  { %v1085_v61 = vrot.slane %v848_v6, %v1724_v31  ;;  %v1053_v34 = vrot.slane %v1963_v15, %v1724_v31  ;;  %v1113_v6 = vrot.slane %v1959_v55, %v1724_v31 }
 0x2b9   :  { %v1206_v49 = vsel %vm1167_vm7, %v1085_v61, %v1205_v24 }
 0x2ba   :  { %v896_v14 = vpop.permute.xlu1 %895  ;;  %v1966_v59 = vpop.permute.xlu0 %871 }
 0x2bb   :  { %v1149_v26 = vrot.slane %v896_v14, %v1724_v31 }
 0x2bd   :  { %v1220_v1 = vsel %vm1167_vm7, %v1149_v26, %v1219_v7  ;;  %v1199_v26 = vsel %vm1167_vm7, %v1053_v34, %v1198_v48 }
 0x2be   :  { %v1969_v9 = vpop.permute.xlu1 %826  ;;  %v803_v17 = vpop.permute.xlu0 %802 }
 0x2bf   :  { %v1025_v57 = vrot.slane %v803_v17, %v1724_v31  ;;  %v1057_v51 = vrot.slane %v1969_v9, %v1724_v31  ;;  %v1210_v17 = vsel %vm301_vm3, %v1105_v29, %v1101_v20 }
 0x2c1   :  { %v1193_v52 = vsel %vm1169_vm8, %v1025_v57, %v1192_v39 }
 0x2c2   :  { %v1971_v58 = vpop.permute.xlu1 %874  ;;  %v851_v27 = vpop.permute.xlu0 %850 }
 0x2c3   :  { %v1089_v38 = vrot.slane %v851_v27, %v1724_v31  ;;  %v1200_v27 = vsel %vm1169_vm8, %v1057_v51, %v1199_v26  ;;  %v1121_v55 = vrot.slane %v1971_v58, %v1724_v31 }
 0x2c5   :  { %v1207_v53 = vsel %vm1169_vm8, %v1089_v38, %v1206_v49 }
 0x2c6   :  { %v806_v0 = vpop.permute.xlu1 %805  ;;  %v899_v8 = vpop.permute.xlu0 %898 }
 0x2c7   :  { %v1153_v16 = vrot.slane %v899_v8, %v1724_v31  ;;  %v1029_v46 = vrot.slane %v806_v0, %v1724_v31  ;;  %v1211_v8 = vsel %vm1163_vm5, %v1109_v43, %v1210_v17 }
 0x2c9   :  { %v1221_v28 = vsel %vm1169_vm8, %v1153_v16, %v1220_v1  ;;  %v1194_v7 = vsel %vm1171_vm9, %v1029_v46, %v1193_v52  ;;  %v1117_v1 = vrot.slane %v1966_v59, %v1724_v31 }
 0x2ca   :  { %v854_v47 = vpop.permute.xlu1 %853  ;;  %v1975_v3 = vpop.permute.xlu0 %829 }
 0x2cb   :  { %v1093_v25 = vrot.slane %v854_v47, %v1724_v31  ;;  %v1061_v23 = vrot.slane %v1975_v3, %v1724_v31  ;;  %v1212_v3 = vsel %vm1165_vm6, %v1113_v6, %v1211_v8 }
 0x2cc   :  { %v1213_v60 = vsel %vm1167_vm7, %v1117_v1, %v1212_v3 }
 0x2cd   :  { %v1208_v14 = vsel %vm1171_vm9, %v1093_v25, %v1207_v53  ;;  %v1201_v47 = vsel %vm1171_vm9, %v1061_v23, %v1200_v27  ;;  %v1214_v19 = vsel %vm1169_vm8, %v1121_v55, %v1213_v60  ;;  %v1475_v60 = vld [vmem:[#allocation2 + $0x10] sm:$0xff] }
 0x2ce   :  { %v902_v2 = vpop.permute.xlu1 %901  ;;  %v1984_v18 = vpop.permute.xlu0 %877 }
 0x2cf   :  { %v1157_v13 = vrot.slane %v902_v2, %v1724_v31  ;;  %v1125_v16 = vrot.slane %v1984_v18, %v1724_v31 }
 0x2d1   :  { %v1996_v37 = vsel %vm1171_vm9, %v1157_v13, %v1221_v28  ;;  %v1215_v2 = vsel %vm1171_vm9, %v1125_v16, %v1214_v19  ;;  %v1427_v13 = vld [vmem:[%s2083_s4] ss:$0 sm:$0xff]  ;;  %s1543_s4 = smov [#allocation5]  }
 0x2d2   :  { %v809_v40 = vpop.permute.xlu1 %808  ;;  %v785_v45 = vpop.permute.xlu0 %784  ;;  %s1414_s17 = sshll.u32 %s1543_s4, 4  ;;  %s1415_s17 = int_to_ptr.vmem [resolvable:$true] %s1414_s17 }
 0x2d3   :  { %v1033_v32 = vrot.slane %v809_v40, %v1724_v31  ;;  %v1001_v33 = vrot.slane %v785_v45, %v1724_v31  ;;  %s1513_s18 = scalar_lea.vmem %s1415_s17, 2048  ;;  %p1518_p9 = scmp.lt.s32.totalorder %s1415_s17, %s1415_s17 }
 0x2d4   :  { %p1514_p8 = scmp.ne.s32.totalorder %s1415_s17, %s1513_s18  ;;  %p1519_p10 = scmp.lt.s32.totalorder %s1513_s18, %s1513_s18 }
 0x2d5   :  { %v1188_v22 = vsel %vm1173_vm10, %v1001_v33, %v1936_v4  ;;  %v1195_v4 = vsel %vm1173_vm10, %v1033_v32, %v1194_v7 }
 0x2d6   :  { %v857_v54 = vpop.permute.xlu1 %856  ;;  %v833_v63 = vpop.permute.xlu0 %832  ;;  %v1239_v41 = vsel %vm1232_vm11, %v1188_v22, 0.0  ;;  %v1242_v59 = vsel %vm1232_vm11, %v1195_v4, 0.0  ;;  %p1520_p11 = por %p1519_p10, %p1518_p9 }
 0x2d7   :  { %v1097_v56 = vrot.slane %v857_v54, %v1724_v31  ;;  %v1065_v15 = vrot.slane %v833_v63, %v1724_v31  ;;  %1240 = vadd.xlane.f32.xlu0 %v1239_v41 }
 0x2d8   :  { %p1521_p12 = pnand %p1520_p11, %p1514_p8 }
 0x2d9   :  { %v1209_v9 = vsel %vm1173_vm10, %v1097_v56, %v1208_v14  ;;  %v1202_v58 = vsel %vm1173_vm10, %v1065_v15, %v1201_v47 }
 0x2da   :  { %v1248_v0 = vsel %vm1232_vm11, %v1209_v9, 0.0  ;;  %v881_v28 = vpop.permute.xlu0 %880  ;;  %v1245_v10 = vsel %vm1232_vm11, %v1202_v58, 0.0  ;;  %v905_v18 = vpop.permute.xlu1 %904 }
 0x2db   :  { %1249 = vadd.xlane.f32.xlu1 %v1248_v0  ;;  %v1129_v11 = vrot.slane %v881_v28, %v1724_v31  ;;  %1243 = vadd.xlane.f32.xlu0 %v1242_v59  ;;  %v1161_v20 = vrot.slane %v905_v18, %v1724_v31  ;;  %v1478_v18 = vld [vmem:[#allocation2 + $0x8] sm:$0xff] }
 0x2dd   :  { %v1216_v5 = vsel %vm1173_vm10, %v1129_v11, %v1215_v2  ;;  %v1223_v50 = vsel %vm1173_vm10, %v1161_v20, %v1996_v37 }
 0x2de   :  { %v1251_v62 = vsel %vm1232_vm11, %v1216_v5, 0.0  ;;  %v1254_v29 = vsel %vm1232_vm11, %v1223_v50, 0.0 }
 0x2df   :  { %1246 = vadd.xlane.f32.xlu0 %v1245_v10  ;;  %v1476_v10 = vld [vmem:[#allocation2 + $0x18] sm:$0xff] }
 0x2e3   :  { %1252 = vadd.xlane.f32.xlu0 %v1251_v62  ;;  %v1477_v62 = vld [vmem:[#allocation2] sm:$0xff] }
 0x2ec   :  { %1267 = vbcast.lane.b32.xlu1 %v1427_v13, 264 }
 0x2f0   :  { %1271 = vbcast.lane.b32.xlu1 %v1427_v13, 272 }
 0x2f9   :  { %1263 = vbcast.lane.b32.xlu0 %v1427_v13, 256 }
 0x307   :  { %v1235_v21 = vpop.xlane.xlu0 %1234 }
 0x30d   :  { %v1238_v30 = vpop.xlane.xlu1 %1237 }
 0x314   :  { %1255 = vadd.xlane.f32.xlu1 %v1254_v29  ;;  %v1479_v29 = vld [vmem:[#allocation2 + $0x20] sm:$0xff] }
 0x325   :  { %1275 = vbcast.lane.b32.xlu1 %v1427_v13, 280 }
 0x364   :  { %v1241_v35 = vpop.xlane.xlu0 %1240 }
 0x368   :  { %v1250_v61 = vpop.xlane.xlu1 %1249  ;;  %v1244_v12 = vpop.xlane.xlu0 %1243 }
 0x36c   :  { %v1268_v36 = vpop.permute.xlu1 %1267  ;;  %v1247_v38 = vpop.xlane.xlu0 %1246 }
 0x36d   :  { %v1282_v57 = vadd.f32 %v1268_v36, %v1238_v30  ;;  %v1286_v15 = vadd.f32 %v1268_v36, %v1250_v61  ;;  %v1480_v30 = vld [vmem:[#allocation2 + $0x28] sm:$0xff] }
 0x36f   :  { %v1429_v40 = vmul.f32 -1.442695, %v1282_v57  ;;  %v1433_v4 = vmul.f32 -1.442695, %v1286_v15  ;;  %v1482_v57 = vld [vmem:[#allocation2 + $0x48] sm:$0xff] }
 0x370   :  { %v1272_v42 = vpop.permute.xlu1 %1271  ;;  %v1253_v31 = vpop.xlane.xlu0 %1252 }
 0x371   :  { %1443 = vpow2.f32 %v1429_v40  ;;  %v1283_v43 = vadd.f32 %v1272_v42, %v1241_v35  ;;  %v1287_v32 = vadd.f32 %v1272_v42, %v1253_v31  ;;  %v1483_v42 = vld [vmem:[#allocation2 + $0x60] sm:$0xff]  ;;  %v1484_v31 = vld [vmem:[#allocation2 + $0x68] sm:$0xff] }
 0x373   :  { %v1430_v44 = vmul.f32 -1.442695, %v1283_v43  ;;  %v1434_v39 = vmul.f32 -1.442695, %v1287_v32 }
 0x374   :  { %v1264_v46 = vpop.permute.xlu0 %1263 }
 0x375   :  { %v1281_v37 = vadd.f32 %v1264_v46, %v1235_v21  ;;  %v1285_v45 = vadd.f32 %v1264_v46, %v1247_v38  ;;  %1445 = vpow2.f32 %v1430_v44 }
 0x377   :  { %v1428_v24 = vmul.f32 -1.442695, %v1281_v37  ;;  %v1432_v25 = vmul.f32 -1.442695, %v1285_v45  ;;  %v1485_v37 = vld [vmem:[#allocation2 + $0x30] sm:$0xff] }
 0x379   :  { %1447 = vpow2.f32 %v1428_v24  ;;  %v1486_v24 = vld [vmem:[#allocation2 + $0x38] sm:$0xff] }
 0x37a   :  { %1449 = vpow2.f32 %v1432_v25 }
 0x37b   :  { %v1444_v33 = vpop.eup %1443 }
 0x37c   :  { %v1314_v48 = vadd.f32 1.0, %v1444_v33  ;;  %v1487_v33 = vld [vmem:[#allocation2 + $0x50] sm:$0xff] }
 0x37e   :  { %1451 = vrcp.f32 %v1314_v48 }
 0x37f   :  { %1453 = vpow2.f32 %v1434_v39  ;;  %v1446_v49 = vpop.eup %1445  ;;  %v1488_v39 = vld [vmem:[#allocation2 + $0x58] sm:$0xff] }
 0x380   :  { %v1315_v53 = vadd.f32 1.0, %v1446_v49 }
 0x383   :  { %v1448_v34 = vpop.eup %1447 }
 0x384   :  { %v1313_v51 = vadd.f32 1.0, %v1448_v34  ;;  %v1450_v52 = vpop.eup %1449 }
 0x385   :  { %v1317_v22 = vadd.f32 1.0, %v1450_v52 }
 0x386   :  { %1455 = vrcp.f32 %v1313_v51  ;;  %v1489_v51 = vld [vmem:[#allocation2 + $0x70] sm:$0xff] }
 0x387   :  { %1457 = vrcp.f32 %v1315_v53  ;;  %v1490_v53 = vld [vmem:[#allocation2 + $0x78] sm:$0xff] }
 0x388   :  { %v1452_v54 = vpop.eup %1451  ;;  %1459 = vrcp.f32 %v1317_v22 }
 0x389   :  { %1344 = vperm.xlu1 %1442, %v1452_v54   ;;  %v1454_v23 = vpop.eup %1453 }
 0x38a   :  { %v1319_v56 = vadd.f32 1.0, %v1454_v23 }
 0x38c   :  { %1461 = vrcp.f32 %v1319_v56 }
 0x38d   :  { %1463 = vpow2.f32 %v1433_v4 }
 0x390   :  { %v1456_v63 = vpop.eup %1455 }
 0x391   :  { %1339 = vperm.xlu0 %1441, %v1456_v63   ;;  %v1458_v41 = vpop.eup %1457 }
 0x392   :  { %v1460_v7 = vpop.eup %1459 }
 0x395   :  { %1349 = vperm.xlu0 %1441, %v1458_v41  }
 0x396   :  { %v1462_v6 = vpop.eup %1461 }
 0x397   :  { %v1464_v55 = vpop.eup %1463 }
 0x398   :  { %v1318_v16 = vadd.f32 1.0, %v1464_v55 }
 0x399   :  { %1359 = vperm.xlu0 %1441, %v1460_v7  }
 0x39d   :  { %1369 = vperm.xlu0 %1441, %v1462_v6  }
 0x3a1   :  { %v1256_v14 = vpop.xlane.xlu1 %1255 }
 0x3a5   :  { %v1276_v26 = vpop.permute.xlu1 %1275 }
 0x3a6   :  { %v1284_v1 = vadd.f32 %v1276_v26, %v1244_v12  ;;  %v1288_v9 = vadd.f32 %v1276_v26, %v1256_v14  ;;  %v1481_v12 = vld [vmem:[#allocation2 + $0x40] sm:$0xff] }
 0x3a8   :  { %v1431_v17 = vmul.f32 -1.442695, %v1284_v1  ;;  %v1435_v27 = vmul.f32 -1.442695, %v1288_v9 }
 0x3aa   :  { %1465 = vpow2.f32 %v1431_v17 }
 0x3ab   :  { %1467 = vpow2.f32 %v1435_v27 }
 0x3b4   :  { %v1466_v0 = vpop.eup %1465 }
 0x3b5   :  { %v1316_v8 = vadd.f32 1.0, %v1466_v0  ;;  %v1468_v28 = vpop.eup %1467 }
 0x3b6   :  { %v1320_v59 = vadd.f32 1.0, %v1468_v28 }
 0x3b7   :  { %1469 = vrcp.f32 %v1316_v8 }
 0x3b8   :  { %1471 = vrcp.f32 %v1318_v16 }
 0x3b9   :  { %1473 = vrcp.f32 %v1320_v59 }
 0x3c1   :  { %v1470_v47 = vpop.eup %1469 }
 0x3c2   :  { %1354 = vperm.xlu1 %1442, %v1470_v47   ;;  %v1472_v3 = vpop.eup %1471 }
 0x3c3   :  { %v1474_v11 = vpop.eup %1473 }
 0x3c6   :  { %1364 = vperm.xlu1 %1442, %v1472_v3  }
 0x3ca   :  { %1374 = vperm.xlu1 %1442, %v1474_v11  }
 0x408   :  { %v1345_v58 = vpop.permute.xlu1 %1344 }
 0x409   :  { %v1379_v19 = vmul.f32 %v1475_v60, %v1345_v58  ;;  %v1380_v2 = vmul.f32 %v1476_v10, %v1345_v58 }
 0x40b   :  { %1395 = vst [vmem:[#allocation5 + $0x10] sm:$0xff] %v1379_v19  ;;  %1396 = vst [vmem:[#allocation5 + $0x18] sm:$0xff] %v1380_v2 }
 0x410   :  { %v1340_v5 = vpop.permute.xlu0 %1339 }
 0x411   :  { %v1377_v13 = vmul.f32 %v1477_v62, %v1340_v5  ;;  %v1378_v20 = vmul.f32 %v1478_v18, %v1340_v5 }
 0x413   :  { %1393 = vst [vmem:[#allocation5] sm:$0xff] %v1377_v13  ;;  %1394 = vst [vmem:[#allocation5 + $0x8] sm:$0xff] %v1378_v20 }
 0x414   :  { %v1350_v50 = vpop.permute.xlu0 %1349 }
 0x415   :  { %v1381_v21 = vmul.f32 %v1479_v29, %v1350_v50  ;;  %v1382_v35 = vmul.f32 %v1480_v30, %v1350_v50 }
 0x417   :  { %1397 = vst [vmem:[#allocation5 + $0x20] sm:$0xff] %v1381_v21  ;;  %1398 = vst [vmem:[#allocation5 + $0x28] sm:$0xff] %v1382_v35 }
 0x418   :  { %v1360_v61 = vpop.permute.xlu0 %1359 }
 0x419   :  { %v1385_v36 = vmul.f32 %v1481_v12, %v1360_v61  ;;  %v1386_v38 = vmul.f32 %v1482_v57, %v1360_v61 }
 0x41b   :  { %1401 = vst [vmem:[#allocation5 + $0x40] sm:$0xff] %v1385_v36  ;;  %1402 = vst [vmem:[#allocation5 + $0x48] sm:$0xff] %v1386_v38 }
 0x41c   :  { %v1370_v40 = vpop.permute.xlu0 %1369 }
 0x41d   :  { %v1389_v43 = vmul.f32 %v1483_v42, %v1370_v40  ;;  %v1390_v44 = vmul.f32 %v1484_v31, %v1370_v40 }
 0x41f   :  { %1405 = vst [vmem:[#allocation5 + $0x60] sm:$0xff] %v1389_v43  ;;  %1406 = vst [vmem:[#allocation5 + $0x68] sm:$0xff] %v1390_v44 }
 0x441   :  { %v1355_v46 = vpop.permute.xlu1 %1354 }
 0x442   :  { %v1383_v45 = vmul.f32 %v1485_v37, %v1355_v46  ;;  %v1384_v25 = vmul.f32 %v1486_v24, %v1355_v46 }
 0x444   :  { %1399 = vst [vmem:[#allocation5 + $0x30] sm:$0xff] %v1383_v45  ;;  %1400 = vst [vmem:[#allocation5 + $0x38] sm:$0xff] %v1384_v25 }
 0x445   :  { %v1365_v32 = vpop.permute.xlu1 %1364 }
 0x446   :  { %v1387_v48 = vmul.f32 %v1487_v33, %v1365_v32  ;;  %v1388_v49 = vmul.f32 %v1488_v39, %v1365_v32 }
 0x448   :  { %1403 = vst [vmem:[#allocation5 + $0x50] sm:$0xff] %v1387_v48  ;;  %1404 = vst [vmem:[#allocation5 + $0x58] sm:$0xff] %v1388_v49 }
 0x449   :  { %v1375_v34 = vpop.permute.xlu1 %1374 }
 0x44a   :  { %v1391_v52 = vmul.f32 %v1489_v51, %v1375_v34  ;;  %v1392_v54 = vmul.f32 %v1490_v53, %v1375_v34 }
 0x44c   :  { %1407 = vst [vmem:[#allocation5 + $0x70] sm:$0xff] %v1391_v52  ;;  %1408 = vst [vmem:[#allocation5 + $0x78] sm:$0xff] %v1392_v54 }
 0x44d   :  { %1524 = shalt.err (!%p1521_p12)
}
 0x44e   :  { %s1525_s21 = scalar_lea.hbm %s2084_s5, 2048 }
 0x44f   :  { %p1526_p13 = scmp.ne.s32.totalorder %s2084_s5, %s1525_s21  ;;  %p1529_p0 = scmp.lt.u32.totalorder %s1525_s21, %s2084_s5 }
 0x451   :  { %p1531_p1 = pnand %p1529_p0, %p1526_p13 }
 0x453   :  { %1534 = shalt.err (!%p1531_p1)
}
 0x454   :  { %1420 = dma.vmem_to_hbm [thread:$0]  %s1415_s17, 2048, %s2084_s5, [#allocation4], %s1540_s28, %s1540_s28, %s1541_s29  }
 0x455   :  { %1537 = dma.done.wait [#allocation4], 2048  }
 0x456   :  { %1538 = vsyncadd [#allocation4], 4294965248 }
 0x457   :  { %1424 = vsyncpa [#allocation3], 1 }
 0x458   :  { %1425 = vsyncpa [#allocation4], 1 }

</bundles_post_ra>
